<compile_context>
chip_gen: v7x
topology: tpu7x:2x2x1
jax: 0.10.0
libtpu: 0.0.40
codegen_flags: <defaults>
</compile_context>

<pallas_src>
import math

import jax
import jax.numpy as jnp
from jax.experimental import pallas as pl
from jax.experimental.pallas import tpu as pltpu


# -----------------------------------------------------------------------------
# Kernel 1: SinusoidalPosEmb (the spec module) — single block, no grid.
# -----------------------------------------------------------------------------
def _sinusoidal_pos_emb_kernel(t_ref, out_ref):
    half = out_ref.shape[-1] // 2
    scale = math.log(10000.0) / (half - 1)
    idx = jax.lax.broadcasted_iota(jnp.int32, (1, half), 1).astype(jnp.float32)
    freqs = jnp.exp(idx * (-scale))                       # (1, half)
    args = t_ref[...] * freqs                             # (B, 1)*(1, half) -> (B, half)
    out_ref[...] = jnp.concatenate([jnp.sin(args), jnp.cos(args)], axis=-1)


def sinusoidal_pos_emb(t, dim):
    """t: (B,) timesteps -> (B, dim) f32 sinusoidal embedding (Pallas)."""
    B = t.shape[0]
    t2 = t.astype(jnp.float32).reshape(B, 1)
    return pl.pallas_call(
        _sinusoidal_pos_emb_kernel,
        out_shape=jax.ShapeDtypeStruct((B, dim), jnp.float32),
        in_specs=[pl.BlockSpec(memory_space=pltpu.MemorySpace.VMEM)],
        out_specs=pl.BlockSpec(memory_space=pltpu.MemorySpace.VMEM),
    )(t2)


def sinusoidal_pos_emb_ref(t, dim):
    """Pure-JAX reference of the PyTorch SinusoidalPosEmb.forward."""
    half = dim // 2
    freqs = jnp.exp(jnp.arange(half, dtype=jnp.float32)
                    * -(math.log(10000.0) / (half - 1)))
    args = t.astype(jnp.float32)[:, None] * freqs[None, :]
    return jnp.concatenate([jnp.sin(args), jnp.cos(args)], axis=-1)


# -----------------------------------------------------------------------------
# Kernel 2: fused forward-diffusion noising + synthetic per-pixel MLP denoiser,
# channels-major layout: rows = B*C (sublanes), cols = H*W (lanes).
# -----------------------------------------------------------------------------
def _fused_diffusion_kernel(x_ref, eps_ref, a2_ref, se_ref, na_ref,
                            w1t_ref, bias_ref, w2t_ref, b2_ref,
                            pert_ref, pred_ref):
    # Stage 1: noising (constants pre-folded host-side):
    #   perturbed = (x*2 - 1)*sa + eps*soma  ==  x*(2*sa) + eps*soma + (-sa)
    pert = x_ref[...] * a2_ref[...] + eps_ref[...] * se_ref[...] + na_ref[...]
    pert_ref[...] = pert                                  # lane-dense (B*C, 128) store

    # Stage 2: per-pixel MLP, channels-major:
    #   h = W1^T @ p_b + (temb_b + b1) ; relu ; y = W2^T @ h + b2
    w1t = w1t_ref[...]          # (hidden, C)
    bias = bias_ref[...]        # (hidden, B)   == (temb + b1)^T
    w2t = w2t_ref[...]          # (C, hidden)
    b2 = b2_ref[...]            # (C, 1)
    hidden, C = w1t.shape
    B = bias.shape[1]

    for b in range(B):                                    # unrolled, B is tiny
        r0 = b * C
        # K = C = 4 contraction as VPU broadcast-FMAs (skip MXU fill/drain).
        h = bias[:, b:b + 1] + w1t[:, 0:1] * pert[r0:r0 + 1, :]
        for c in range(1, C):
            h = h + w1t[:, c:c + 1] * pert[r0 + c:r0 + c + 1, :]
        h = jnp.maximum(h, 0.0)                           # (hidden, blk)
        y = jnp.dot(w2t, h, preferred_element_type=jnp.float32) + b2
        pred_ref[r0:r0 + C, :] = y                        # lane-dense store


def diffusion_forward_fused(params, x01, eps, temb, sqrt_ab_t, sqrt_omab_t):
    """x01/eps: (B,C,H,W); temb: (B,hidden); per-batch scalars: (B,)."""
    B, C, H, W = x01.shape
    HW = H * W
    hidden = params["w1"].shape[1]

    # Native NCHW flatten -> (B*C, HW): no transposes anywhere.
    x2 = x01.reshape(B * C, HW).astype(jnp.float32)
    e2 = eps.reshape(B * C, HW).astype(jnp.float32)

    sa = sqrt_ab_t.astype(jnp.float32)
    soma = sqrt_omab_t.astype(jnp.float32)
    a2 = jnp.repeat(2.0 * sa, C).reshape(B * C, 1)        # 2*sqrt(alpha_bar[t])
    se = jnp.repeat(soma, C).reshape(B * C, 1)            # sqrt(1-alpha_bar[t])
    na = jnp.repeat(-sa, C).reshape(B * C, 1)             # -sqrt(alpha_bar[t])

    # Weights pre-transposed host-side so the kernel never relayouts.
    w1t = params["w1"].T.astype(jnp.float32)              # (hidden, C)
    bias = (temb + params["b1"]).T.astype(jnp.float32)    # (hidden, B)
    w2t = params["w2"].T.astype(jnp.float32)              # (C, hidden)
    b2 = params["b2"].reshape(C, 1).astype(jnp.float32)   # (C, 1)

    # 2-way "parallel" split of HW: uses both TCs on v7x, near-free on v5e/v6e.
    # If images are ever scaled up, keep lane_blk at 128-2048 so per-block VMEM
    # stays small (v7x has 64 MiB VMEM); bf16 inputs for the matmul path would
    # be the next scaling move on v6e/v7x.
    lane_blk = 128 if HW % 128 == 0 else HW
    n_blk = HW // lane_blk

    row_spec = pl.BlockSpec((B * C, lane_blk), lambda s: (0, s))

    def full(shape):
        return pl.BlockSpec(shape, lambda s: (0, 0))

    pert, pred = pl.pallas_call(
        _fused_diffusion_kernel,
        out_shape=(jax.ShapeDtypeStruct((B * C, HW), jnp.float32),
                   jax.ShapeDtypeStruct((B * C, HW), jnp.float32)),
        grid=(n_blk,),
        in_specs=[
            row_spec,                 # x
            row_spec,                 # eps
            full((B * C, 1)),         # 2*sqrt(alpha_bar)
            full((B * C, 1)),         # sqrt(1-alpha_bar)
            full((B * C, 1)),         # -sqrt(alpha_bar)
            full((hidden, C)),        # W1^T
            full((hidden, B)),        # (temb + b1)^T
            full((C, hidden)),        # W2^T
            full((C, 1)),             # b2
        ],
        out_specs=[row_spec, row_spec],
        compiler_params=pltpu.CompilerParams(dimension_semantics=("parallel",)),
    )(x2, e2, a2, se, na, w1t, bias, w2t, b2)

    return pert.reshape(B, C, H, W), pred.reshape(B, C, H, W)


# -----------------------------------------------------------------------------
# Diffusion module (schedule + forward process), mirroring the PyTorch class.
# -----------------------------------------------------------------------------
def cosine_schedule(timesteps, s=0.008):
    t = jnp.linspace(0.0, timesteps, timesteps + 1, dtype=jnp.float32) / timesteps
    f_t = jnp.cos((t + s) / (1.0 + s) * (math.pi / 2.0)) ** 2
    alphas_cumprod = f_t / f_t[0]
    betas = 1.0 - alphas_cumprod[1:] / alphas_cumprod[:-1]
    return jnp.clip(betas, 0.0001, 0.9999)


class DiffusionPallas:
    def __init__(self, model_params, image_resolution=(16, 16, 4),
                 n_times=1000, use_cosine_schedule=True):
        self.n_times = n_times
        self.img_H, self.img_W, self.img_C = image_resolution
        self.model_params = model_params
        self.hidden = model_params["w1"].shape[1]

        if use_cosine_schedule:
            betas = cosine_schedule(n_times)
        else:
            betas = jnp.linspace(0.0001, 0.02, n_times, dtype=jnp.float32)

        self.sqrt_betas = jnp.sqrt(betas)
        self.alphas = 1.0 - betas
        self.sqrt_alphas = jnp.sqrt(self.alphas)
        alpha_bars = jnp.cumprod(self.alphas, axis=0)
        self.sqrt_one_minus_alpha_bars = jnp.sqrt(1.0 - alpha_bars)
        self.sqrt_alpha_bars = jnp.sqrt(alpha_bars)

    def forward(self, x_zeros, key):
        """x_zeros: (B, C, H, W) in [0, 1] -> (perturbed, epsilon, pred_eps)."""
        B = x_zeros.shape[0]
        key_t, key_eps = jax.random.split(key)
        t = jax.random.randint(key_t, (B,), 0, self.n_times, dtype=jnp.int32)
        epsilon = jax.random.normal(key_eps, x_zeros.shape, dtype=jnp.float32)

        sqrt_ab_t = self.sqrt_alpha_bars[t]                # extract()
        sqrt_omab_t = self.sqrt_one_minus_alpha_bars[t]    # extract()

        temb = sinusoidal_pos_emb(t, self.hidden)          # Pallas kernel (spec module)
        perturbed, pred_epsilon = diffusion_forward_fused(
            self.model_params, x_zeros, epsilon, temb, sqrt_ab_t, sqrt_omab_t)
        return perturbed, epsilon, pred_epsilon

    # TODO(synk): sample()/denoise_at_t() (reverse-process loop over n_times)
    # is a sequential host-side loop; not implemented as a Pallas kernel here.


def init_denoiser_params(key, channels, hidden):
    k1, k2 = jax.random.split(key)
    w1 = jax.random.normal(k1, (channels, hidden), jnp.float32) / math.sqrt(channels)
    b1 = jnp.zeros((1, hidden), jnp.float32)
    w2 = jax.random.normal(k2, (hidden, channels), jnp.float32) / math.sqrt(hidden)
    b2 = jnp.zeros((1, channels), jnp.float32)
    return {"w1": w1, "b1": b1, "w2": w2, "b2": b2}


def diffusion_forward_ref(diff, params, x, t, eps):
    """Pure-JAX reference of the fused kernel (pixel-major formulation)."""
    B, C, H, W = x.shape
    sa = diff.sqrt_alpha_bars[t][:, None, None, None]
    soma = diff.sqrt_one_minus_alpha_bars[t][:, None, None, None]
    pert = (x * 2.0 - 1.0) * sa + eps * soma
    temb = sinusoidal_pos_emb_ref(t, params["w1"].shape[1])
    xt = jnp.transpose(pert, (0, 2, 3, 1)).reshape(B, H * W, C)
    h = jnp.maximum(xt @ params["w1"] + params["b1"] + temb[:, None, :], 0.0)
    y = h @ params["w2"] + params["b2"]
    pred = jnp.transpose(y.reshape(B, H, W, C), (0, 3, 1, 2))
    return pert, pred


if __name__ == "__main__":
    B, C, H, W = 2, 4, 16, 16
    HIDDEN = 32
    N_TIMES = 1000

    root = jax.random.PRNGKey(0)
    k_params, k_x, k_fwd = jax.random.split(root, 3)

    params = init_denoiser_params(k_params, C, HIDDEN)
    diffusion = DiffusionPallas(params, image_resolution=(H, W, C),
                                n_times=N_TIMES, use_cosine_schedule=True)

    x = jax.random.uniform(k_x, (B, C, H, W), dtype=jnp.float32)  # images in [0,1]

    perturbed, epsilon, pred_epsilon = diffusion.forward(x, k_fwd)
    jax.block_until_ready((perturbed, epsilon, pred_epsilon))

    assert perturbed.shape == (B, C, H, W)
    assert epsilon.shape == (B, C, H, W)
    assert pred_epsilon.shape == (B, C, H, W)

    # --- correctness checks against pure-JAX references -----------------------
    # Reproduce the randomness drawn inside forward() deterministically.
    key_t, key_eps = jax.random.split(k_fwd)
    t = jax.random.randint(key_t, (B,), 0, N_TIMES, dtype=jnp.int32)
    eps_ref = jax.random.normal(key_eps, x.shape, dtype=jnp.float32)

    # SinusoidalPosEmb kernel vs the spec formula.
    emb_k = sinusoidal_pos_emb(t, HIDDEN)
    emb_r = sinusoidal_pos_emb_ref(t, HIDDEN)
    assert emb_k.shape == (B, HIDDEN)
    assert jnp.allclose(emb_k, emb_r, atol=1e-2, rtol=1e-2)

    # Fused noising + denoiser kernel vs reference (loose tol: matmul precision).
    pert_r, pred_r = diffusion_forward_ref(diffusion, params, x, t, eps_ref)
    assert jnp.allclose(epsilon, eps_ref)
    assert jnp.allclose(perturbed, pert_r, atol=1e-4, rtol=1e-4)
    assert jnp.allclose(pred_epsilon, pred_r, atol=5e-2, rtol=5e-2)

    print("KERNEL_OK")
</pallas_src>

<mosaic_0001>
module attributes {stable_mosaic.version = 11 : i64} {
  func.func @_sinusoidal_pos_emb_kernel(%arg0: memref<2x1xf32, #tpu.memory_space<vmem>>, %arg1: memref<2x32xf32, #tpu.memory_space<vmem>>) attributes {dimension_semantics = [], scalar_prefetch = 0 : i64, scratch_operands = 0 : i64, tpu.core_type = #tpu.core_type<tc>} {
    %0 = tpu.iota {dimensions = array<i32: 1>} : vector<1x16xi32>
    %1 = arith.sitofp %0 : vector<1x16xi32> to vector<1x16xf32>
    %cst = arith.constant -0.614022672 : f32
    %2 = vector.broadcast %cst : f32 to vector<1x16xf32>
    %3 = arith.mulf %1, %2 : vector<1x16xf32>
    %4 = math.exp %3 : vector<1x16xf32>
    %c0 = arith.constant 0 : index
    %c0_0 = arith.constant 0 : index
    %5 = vector.load %arg0[%c0, %c0_0] : memref<2x1xf32, #tpu.memory_space<vmem>>, vector<2x1xf32>
    %6 = vector.broadcast %5 : vector<2x1xf32> to vector<2x16xf32>
    %7 = vector.broadcast %4 : vector<1x16xf32> to vector<2x16xf32>
    %8 = arith.mulf %6, %7 : vector<2x16xf32>
    %9 = math.sin %8 : vector<2x16xf32>
    %10 = math.cos %8 : vector<2x16xf32>
    %11 = tpu.concatenate %9, %10 in 1 : vector<2x16xf32>, vector<2x16xf32> -> vector<2x32xf32>
    %c0_1 = arith.constant 0 : index
    %c0_2 = arith.constant 0 : index
    %12 = vector.load %arg1[%c0_1, %c0_2] : memref<2x32xf32, #tpu.memory_space<vmem>>, vector<2x32xf32>
    tpu.vector_store %arg1[%c0_1, %c0_2], %11 {strides = array<i32>} : memref<2x32xf32, #tpu.memory_space<vmem>>, vector<2x32xf32>,
    return
  }
}

</mosaic_0001>

<bundles_post_ra>
// kernel: tpu_custom_call.1
= control target key start
LH: loop header
LB: loop body
LE: loop exit
PB: predicated region body
PF: predicated region fallthrough
CT: control target
= control target key end

     0   :  { %v303_v1 = vmov 0   ;;  %s358_s0 = inlined_call_operand.vmem [shape: f32[2,1], index: 0, kind: input, shape index: {}]   ;;  %s359_s1 = inlined_call_operand.hbm [shape: f32[2,32], index: 1, kind: output, shape index: {}]  }
   0x1   :  { %v15_v0 = vld [vmem:[%s358_s0] sm:$0x3]  ;;  %272 = vset.pattern.permute.xlu0 %v303_v1 }
   0x2   :  { %18 = vperm.xlu0 %272, %v15_v0  }
   0x3   :  { %6 = vsyncpa [#allocation3], 0  ;;  %v9_v2 = vlaneseq  ;;  %v304_v20 = vmov 683565275   ;;  %v305_v22 = vmov 2475754826  }
   0x4   :  { %v306_v25 = vmov 2131351028   ;;  %v307_v28 = vmov 2102212464   ;;  %v308_v31 = vmov 920167782  }
   0x5   :  { %v10_v3 = vand.u32 127, %v9_v2  ;;  %v309_v34 = vmov 1326507024   ;;  %s310_s0 = smov 16   ;;  %s311_s8 = smov [#allocation2]  }
   0x6   :  { %s243_s9 = sshll.u32 %s311_s8, 4  ;;  %s244_s9 = int_to_ptr.vmem [resolvable:$true] %s243_s9 }
   0x7   :  { %v11_v4 = vcvt.s32.f32 %v10_v3  ;;  %s279_s10 = scalar_lea.vmem %s244_s9, 32  ;;  %p284_p1 = scmp.lt.s32.totalorder %s244_s9, %s244_s9 }
   0x8   :  { %p280_p0 = scmp.ne.s32.totalorder %s244_s9, %s279_s10  ;;  %p285_p2 = scmp.lt.s32.totalorder %s279_s10, %s279_s10 }
   0x9   :  { %v12_v5 = vmul.f32 -0.6140227, %v11_v4 }
   0xa   :  { %p286_p3 = por %p285_p2, %p284_p1 }
   0xb   :  { %v13_v6 = vmul.f32 1.442695, %v12_v5 }
   0xc   :  { %p287_p4 = pnand %p286_p3, %p280_p0 }
   0xd   :  { %273 = vpow2.f32 %v13_v6 }
  0x17   :  { %v274_v7 = vpop.eup %273 }
  0x81   :  { %v19_v8 = vpop.permute.xlu0 %18 }
  0x82   :  { %v325_v9 = vmul.f32 %v274_v7, %v19_v8 }
  0x84   :  { %v25_v10 = vand.u32 2139095040, %v325_v9  ;;  %v22_v14 = vand.u32 2147483647, %v325_v9  ;;  %vm24_vm7 = vcmp.lt.s32.totalorder %v325_v9, 0  ;;  %vm114_vm15 = vweird.f32 %v325_v9 }
  0x86   :  { %v26_v11 = vshrl.u32 %v25_v10, 23  ;;  %v29_v17 = vand.u32 8388607, %v22_v14  ;;  %vm23_vm8 = vcmp.le.f32.partialorder %v22_v14, 0.7853982 }
  0x88   :  { %v251_v12 = vadd.s32 4294967169, %v26_v11  ;;  %v30_v36 = vor.u32 8388608, %v29_v17 }
  0x8a   :  { %v32_v13 = vadd.s32 1, %v251_v12  ;;  %v70_v50 = vshll.u32 %v30_v36, 8 }
  0x8c   :  { %vm33_vm0 = vcmp.gt.s32.totalorder %v32_v13, 0 }
  0x8d   :  { %v34_v15 = vsel %vm33_vm0, %v32_v13, 0  ;;  %vm233_vm0 = vcmask 130048  }
  0x8e   :  { %v36_v16 = vand.u32 31, %v34_v15  ;;  %v35_v19 = vshrl.u32 %v34_v15, 5 }
  0x90   :  { %v37_v18 = vsub.s32 32, %v36_v16  ;;  %v39_v21 = vshll.u32 %v304_v20, %v36_v16  ;;  %v42_v23 = vshll.u32 %v305_v22, %v36_v16  ;;  %v45_v27 = vshll.u32 %v306_v25, %v36_v16 }
  0x91   :  { %v48_v30 = vshll.u32 %v307_v28, %v36_v16  ;;  %v51_v33 = vshll.u32 %v308_v31, %v36_v16  ;;  %vm54_vm1 = vcmp.lt.s32.totalorder %v35_v19, 1  ;;  %vm57_vm2 = vcmp.lt.s32.totalorder %v35_v19, 4 }
  0x92   :  { %v40_v24 = vshrl.u32 %v305_v22, %v37_v18  ;;  %v43_v26 = vshrl.u32 %v306_v25, %v37_v18  ;;  %v46_v29 = vshrl.u32 %v307_v28, %v37_v18  ;;  %v49_v32 = vshrl.u32 %v308_v31, %v37_v18 }
  0x93   :  { %v52_v35 = vshrl.u32 %v309_v34, %v37_v18  ;;  %v38_v45 = vshrl.u32 %v304_v20, %v37_v18  ;;  %vm56_vm3 = vcmp.lt.s32.totalorder %v35_v19, 3  ;;  %vm55_vm4 = vcmp.lt.s32.totalorder %v35_v19, 2 }
  0x94   :  { %v41_v37 = vor.u32 %v40_v24, %v39_v21  ;;  %v44_v38 = vor.u32 %v43_v26, %v42_v23  ;;  %v47_v39 = vor.u32 %v46_v29, %v45_v27  ;;  %v50_v40 = vor.u32 %v49_v32, %v48_v30 }
  0x95   :  { %v53_v41 = vor.u32 %v52_v35, %v51_v33 }
  0x96   :  { %v59_v42 = vsel %vm57_vm2, %v47_v39, 2102212464  ;;  %v62_v43 = vsel %vm54_vm1, %v41_v37, %v44_v38  ;;  %v66_v44 = vsel %vm54_vm1, %v44_v38, %v47_v39  ;;  %v63_v46 = vsel %vm57_vm2, %v50_v40, 920167782 }
  0x97   :  { %v67_v47 = vsel %vm57_vm2, %v53_v41, 1326507024  ;;  %v64_v48 = vsel %vm56_vm3, %v47_v39, %v63_v46  ;;  %v58_v51 = vsel %vm54_vm1, %v38_v45, %v41_v37  ;;  %v60_v52 = vsel %vm56_vm3, %v44_v38, %v59_v42 }
  0x98   :  { %v68_v49 = vsel %vm56_vm3, %v50_v40, %v67_v47  ;;  %v65_v53 = vsel %vm55_vm4, %v62_v43, %v64_v48  ;;  %v61_v59 = vsel %vm55_vm4, %v58_v51, %v60_v52  ;;  %vm235_vm1 = vcmask 254976  }
  0x99   :  { %v69_v54 = vsel %vm55_vm4, %v66_v44, %v68_v49  ;;  %v334_v57 = vmul.u32.u64.low %v70_v50, %v65_v53  ;;  %v335_v58 = vmul.u32.u64.high %v70_v50, %v65_v53, %v334_v57  ;;  %v77_v61 = vmul.u32 %v70_v50, %v61_v59 }
  0x9a   :  { %v331_v55 = vmul.u32.u64.low %v70_v50, %v69_v54  ;;  %v332_v56 = vmul.u32.u64.high %v70_v50, %v69_v54, %v331_v55 }
  0x9b   :  { %v80_v60 = vadd.s32 1, %v335_v58 }
  0x9c   :  { %vm79_vm5 = vc.u32 %v332_v56, %v334_v57  ;;  %v78_v10 = vadd.s32 %v334_v57, %v332_v56 }
  0x9d   :  { %v81_v62 = vsel %vm79_vm5, %v80_v60, %v335_v58 }
  0x9e   :  { %v82_v63 = vadd.s32 %v81_v62, %v77_v61 }
  0xa0   :  { %v83_v0 = vadd.s32 536870912, %v82_v63 }
  0xa2   :  { %v84_v1 = vshrl.u32 %v83_v0, 30 }
  0xa4   :  { %v85_v2 = vshll.u32 %v84_v1, 30  ;;  %v108_v23 = vsub.s32 4, %v84_v1 }
  0xa6   :  { %v86_v3 = vsub.s32 %v82_v63, %v85_v2  ;;  %v109_v26 = vsel %vm24_vm7, %v108_v23, %v84_v1 }
  0xa7   :  { %v111_v28 = vsel %vm23_vm8, 0, %v109_v26 }
  0xa8   :  { %v88_v4 = vsub.s32 0, %v86_v3  ;;  %v115_v29 = vadd.s32 3, %v111_v28  ;;  %v219_v31 = vand.u32 3, %v111_v28 }
  0xaa   :  { %v252_v5 = vmin.u32 %v88_v4, %v86_v3  ;;  %v116_v30 = vand.u32 3, %v115_v29  ;;  %vm224_vm10 = vcmp.eq.s32.totalorder %v219_v31, 2  ;;  %vm221_vm12 = vcmp.eq.s32.totalorder %v219_v31, 0 }
  0xab   :  { %vm220_vm14 = vcmp.lt.s32.totalorder %v219_v31, 2 }
  0xac   :  { %v90_v6 = vclz %v252_v5  ;;  %vm121_vm9 = vcmp.eq.s32.totalorder %v116_v30, 2  ;;  %vm118_vm11 = vcmp.eq.s32.totalorder %v116_v30, 0  ;;  %vm117_vm13 = vcmp.lt.s32.totalorder %v116_v30, 2 }
  0xae   :  { %v253_v7 = vadd.s32 4294967294, %v90_v6 }
  0xb0   :  { %vm254_vm6 = vcmp.lt.s32.totalorder %v253_v7, 0 }
  0xb1   :  { %v93_v8 = vsel %vm254_vm6, 0, %v253_v7 }
  0xb2   :  { %v94_v11 = vsub.s32 32, %v93_v8  ;;  %v98_v12 = vsub.s32 4294967266, %v93_v8  ;;  %v95_v13 = vshll.u32 %v86_v3, %v93_v8 }
  0xb4   :  { %v96_v15 = vshrl.u32 %v78_v10, %v94_v11  ;;  %v99_v16 = vadd.s32 127, %v98_v12 }
  0xb6   :  { %v97_v17 = vor.u32 %v96_v15, %v95_v13  ;;  %v100_v18 = vshll.u32 %v99_v16, 23 }
  0xb8   :  { %v101_v19 = vor.u32 4788187, %v100_v18  ;;  %v104_v21 = vcvt.s32.f32 %v97_v17 }
  0xba   :  { %v102_v20 = vand.u32 2147483647, %v101_v19 }
  0xbc   :  { %v105_v22 = vmul.f32 %v104_v21, %v102_v20 }
  0xbe   :  { %v106_v24 = vxor.u32 2147483648, %v105_v22 }
  0xc0   :  { %v107_v25 = vsel %vm24_vm7, %v106_v24, %v105_v22 }
  0xc1   :  { %v110_v27 = vsel %vm23_vm8, %v325_v9, %v107_v25 }
  0xc2   :  { %275 = vcosq.f32 %v110_v27 }
  0xc3   :  { %277 = vsinq.f32 %v110_v27 }
  0xcc   :  { %v276_v32 = vpop.eup %275 }
  0xcd   :  { %v278_v33 = vpop.eup %277  ;;  %v122_v34 = vxor.u32 2147483648, %v276_v32 }
  0xce   :  { %v119_v35 = vxor.u32 2147483648, %v278_v33 }
  0xcf   :  { %v226_v36 = vsel %vm224_vm10, %v122_v34, %v278_v33  ;;  %v123_v37 = vsel %vm121_vm9, %v122_v34, %v278_v33 }
  0xd0   :  { %v223_v14 = vsel %vm221_vm12, %v276_v32, %v119_v35  ;;  %v120_v38 = vsel %vm118_vm11, %v276_v32, %v119_v35 }
  0xd1   :  { %v227_v39 = vsel %vm220_vm14, %v223_v14, %v226_v36  ;;  %v124_v40 = vsel %vm117_vm13, %v120_v38, %v123_v37 }
  0xd2   :  { %v228_v41 = vsel %vm114_vm15, nan, %v227_v39  ;;  %v125_v42 = vsel %vm114_vm15, nan, %v124_v40 }
  0xd3   :  { %230 = vrot.lane.b32.xlu0 %v228_v41, %s310_s0 }
 0x145   :  { %v231_v43 = vpop.permute.xlu0 %230 }
 0x146   :  { %v234_v44 = vsel %vm233_vm0, %v125_v42, %v231_v43 }
 0x147   :  { %236 = vst.msk [vmem:[#allocation2] sm:$0x3] %vm235_vm1, %v234_v44 }
 0x148   :  { %290 = shalt.err (!%p287_p4)
}
 0x149   :  { %s291_s13 = scalar_lea.hbm %s359_s1, 32 }
 0x14a   :  { %p292_p5 = scmp.ne.s32.totalorder %s359_s1, %s291_s13  ;;  %p295_p6 = scmp.lt.u32.totalorder %s291_s13, %s359_s1 }
 0x14c   :  { %p297_p7 = pnand %p295_p6, %p292_p5 }
 0x14e   :  { %300 = shalt.err (!%p297_p7)
}
 0x14f   :  { %246 = dma.vmem_to_hbm [thread:$0]  %s244_s9, 32, %s359_s1, [#allocation3]  }
 0x150   :  { %301 = dma.done.wait [#allocation3], 32  }
 0x151   :  { %302 = vsyncadd [#allocation3], 4294967264 }
 0x152   :  { %250 = vsyncpa [#allocation3], 1 }

</bundles_post_ra>
